<compile_context>
chip_gen: v5e
topology: v5e:2x2
jax: 0.10.0
libtpu: 0.0.40
codegen_flags: <defaults>
</compile_context>

<pallas_src>
import functools
import math

import jax
import jax.numpy as jnp
from jax.experimental import pallas as pl
from jax.experimental.pallas import tpu as pltpu

NEG_INIT = -1e30  # finite "minus infinity" for the running max / padded bias


def _round_up(x, m):
    return (x + m - 1) // m * m


def _tpu_defaults():
    """Per-device tile defaults + real per-core VMEM capacity."""
    kind = ""
    try:
        kind = jax.devices()[0].device_kind.lower()
    except Exception:
        pass
    try:
        vmem_cap = int(getattr(pltpu.get_tpu_info(), "vmem_capacity_bytes",
                               64 * 1024 * 1024))
    except Exception:
        vmem_cap = 64 * 1024 * 1024          # conservative (v7x per-core)
    vmem_cap = max(vmem_cap, 48 * 1024 * 1024)
    if "v5" in kind and ("lite" in kind or "v5e" in kind):
        # v5e: 128x128 MXU, ~0.8 TB/s HBM -> tm=128, spend VMEM on larger /
        # deeper weight tiles instead of a bigger row tile.
        return {"tm": 128, "tv": 1024, "weight_buffers": 3, "vmem_cap": vmem_cap}
    # v6e / v7x: 256-wide MXU, higher HBM BW -> bigger row tile.
    return {"tm": 256, "tv": 512, "weight_buffers": 2, "vmem_cap": vmem_cap}


def _weight_block_spec(D, tv, weight_buffers):
    idx = lambda i, j: (0, j)
    if weight_buffers and int(weight_buffers) > 2:
        try:  # deeper buffering (v5e): hide DMA jitter on the weight stream
            return pl.BlockSpec((D, tv), idx,
                                pipeline_mode=pl.Buffered(int(weight_buffers)))
        except (TypeError, AttributeError):
            pass
    return pl.BlockSpec((D, tv), idx)


# --------------------------------------------------------------------------
# Pass 1: per-tile logits + online per-row logsumexp.
# --------------------------------------------------------------------------
def _logits_lse_kernel(x_ref, w_ref, b_ref, logits_ref, lse_ref, m_sc, l_sc):
    # x_ref:      (tm, D)   activations (bf16/f32)
    # w_ref:      (D, tv)   weight vocab tile (bf16/f32), already transposed
    # b_ref:      (1, V_p)  f32 bias, VMEM-resident (padded cols = NEG_INIT)
    # logits_ref: (tm, tv)  f32 output tile (written every step)
    # lse_ref:    (tm, 1)   f32 per-row logsumexp (row-resident, written last)
    # m_sc, l_sc: (tm, 1)   f32 running max / running sum-exp
    j = pl.program_id(1)
    tv = logits_ref.shape[-1]

    @pl.when(j == 0)
    def _init():
        m_sc[...] = jnp.full_like(m_sc, NEG_INIT)
        l_sc[...] = jnp.zeros_like(l_sc)

    # (tm, D) @ (D, tv) -> (tm, tv) on the MXU, f32 accumulation.
    logits = jax.lax.dot_general(
        x_ref[...], w_ref[...],
        dimension_numbers=(((1,), (0,)), ((), ())),
        preferred_element_type=jnp.float32,
    )
    col = pl.multiple_of(j * tv, tv)
    logits = logits + b_ref[:, pl.ds(col, tv)]

    logits_ref[...] = logits

    # Online max / logsumexp accumulation across vocab tiles (f32 epilogue).
    m_prev = m_sc[...]
    m_new = jnp.maximum(m_prev, jnp.max(logits, axis=-1, keepdims=True))
    l_sc[...] = (l_sc[...] * jnp.exp(m_prev - m_new)
                 + jnp.sum(jnp.exp(logits - m_new), axis=-1, keepdims=True))
    m_sc[...] = m_new

    @pl.when(j == pl.num_programs(1) - 1)
    def _finalize():
        lse_ref[...] = m_sc[...] + jnp.log(l_sc[...])


# --------------------------------------------------------------------------
# Pass 2: streaming normalization  out = logits - lse  (cast to out_dtype).
# --------------------------------------------------------------------------
def _normalize_kernel(logits_ref, lse_ref, o_ref):
    o_ref[...] = (logits_ref[...] - lse_ref[...]).astype(o_ref.dtype)


# --------------------------------------------------------------------------
# One-time parameter preparation (hoisted out of the hot path).
# --------------------------------------------------------------------------
def prepare_generator_params(weight, bias, *, tv=512, use_bf16_matmul=True):
    """Pad + cast + transpose once.  weight: [V, D] (PyTorch nn.Linear layout)."""
    V, D = weight.shape
    tv = _round_up(max(int(tv), 128), 128)
    tv = min(tv, _round_up(V, 128))
    V_p = _round_up(V, tv)
    mat_dtype = jnp.bfloat16 if use_bf16_matmul else jnp.asarray(weight).dtype
    w_t = jnp.asarray(weight).astype(mat_dtype).T          # [D, V]
    b = jnp.asarray(bias).astype(jnp.float32)
    if V_p != V:
        w_t = jnp.pad(w_t, ((0, 0), (0, V_p - V)))
        # Padded vocab columns: huge negative bias -> exp() contributes 0.
        b = jnp.pad(b, (0, V_p - V), constant_values=NEG_INIT)
    return {"w_t": w_t, "b_p": b.reshape(1, V_p), "V": int(V), "tv": int(tv)}


# --------------------------------------------------------------------------
# Hot path: prepared params -> log-probs.
# --------------------------------------------------------------------------
@functools.partial(jax.jit,
                   static_argnames=("V", "tm", "tv", "weight_buffers",
                                    "vmem_cap", "out_dtype"))
def generator_apply(x, w_t, b_p, *, V, tm=256, tv=512, weight_buffers=2,
                    vmem_cap=64 * 1024 * 1024, out_dtype=None):
    """log_softmax(x @ W^T + b, axis=-1) with params from prepare_generator_params.

    x: [..., D]; w_t: [D, V_p]; b_p: [1, V_p]; V: true vocab size.
    """
    lead = x.shape[:-1]
    D = x.shape[-1]
    M = int(math.prod(lead)) if lead else 1
    V_p = w_t.shape[1]
    assert w_t.shape[0] == D, (w_t.shape, D)
    assert tv % 128 == 0 and V_p % tv == 0, (V_p, tv)

    out_dtype = jnp.dtype(out_dtype) if out_dtype is not None else x.dtype
    out_bytes = out_dtype.itemsize
    mat_bytes = jnp.dtype(w_t.dtype).itemsize

    # Row tile: multiple of 8 (sublane), at most `tm`, at most padded M.
    tm = _round_up(max(int(tm), 8), 8)
    tm_eff = min(tm, _round_up(M, 8))
    M_p = _round_up(M, tm_eff)

    x2 = x.reshape(M, D).astype(w_t.dtype)
    if M_p != M:
        x2 = jnp.pad(x2, ((0, M_p - M), (0, 0)))

    # ---- pass 1: logits tiles + per-row logsumexp -------------------------
    # VMEM footprint is independent of the vocab size (fits v7x's 64 MiB).
    n_wbuf = max(2, int(weight_buffers))
    vmem_est = (2 * tm_eff * D * mat_bytes           # activation tiles
                + n_wbuf * D * tv * mat_bytes        # weight tiles
                + 2 * V_p * 4                        # resident bias
                + 2 * tm_eff * tv * 4                # logits out tiles
                + 6 * tm_eff * 4                     # lse out + m/l scratch
                + (4 << 20))                         # headroom
    vmem_limit = int(min(max(vmem_est, 32 << 20), int(vmem_cap * 0.85)))

    grid = (M_p // tm_eff, V_p // tv)
    logits, lse = pl.pallas_call(
        _logits_lse_kernel,
        out_shape=(jax.ShapeDtypeStruct((M_p, V_p), jnp.float32),
                   jax.ShapeDtypeStruct((M_p, 1), jnp.float32)),
        grid=grid,
        in_specs=[
            pl.BlockSpec((tm_eff, D), lambda i, j: (i, 0)),    # activations
            _weight_block_spec(D, tv, weight_buffers),         # [D, tv] weight
            pl.BlockSpec((1, V_p), lambda i, j: (0, 0)),       # resident bias
        ],
        out_specs=(
            pl.BlockSpec((tm_eff, tv), lambda i, j: (i, j)),   # logits tile
            pl.BlockSpec((tm_eff, 1), lambda i, j: (i, 0)),    # per-row lse
        ),
        scratch_shapes=[pltpu.VMEM((tm_eff, 1), jnp.float32),  # running max
                        pltpu.VMEM((tm_eff, 1), jnp.float32)], # running sumexp
        compiler_params=pltpu.CompilerParams(
            dimension_semantics=("parallel", "arbitrary"),
            vmem_limit_bytes=vmem_limit),
    )(x2, w_t, b_p)
    # TODO(synk): for decode-sized M on v7x (2 TensorCores), also split the
    # vocab axis across cores with per-core partial (m, l) + a tiny combine so
    # a single row tile does not leave one core idle.

    # ---- pass 2: streaming normalization (logits - lse) -------------------
    tv_n = tv
    while (V_p % (tv_n * 2) == 0
           and 2 * tm_eff * (tv_n * 2) * (4 + out_bytes) <= (8 << 20)):
        tv_n *= 2

    out = pl.pallas_call(
        _normalize_kernel,
        out_shape=jax.ShapeDtypeStruct((M_p, V_p), out_dtype),
        grid=(M_p // tm_eff, V_p // tv_n),
        in_specs=[
            pl.BlockSpec((tm_eff, tv_n), lambda i, j: (i, j)),
            pl.BlockSpec((tm_eff, 1), lambda i, j: (i, 0)),
        ],
        out_specs=pl.BlockSpec((tm_eff, tv_n), lambda i, j: (i, j)),
        compiler_params=pltpu.CompilerParams(
            dimension_semantics=("parallel", "parallel")),
    )(logits, lse)

    out = out[:M, :V]
    return out.reshape(*lead, V)


# --------------------------------------------------------------------------
# Convenience wrapper (one-shot use: prepares params, then applies).
# --------------------------------------------------------------------------
def generator_forward(x, weight, bias, *, tm=None, tv=None, out_dtype=None,
                      use_bf16_matmul=True):
    """log_softmax(x @ weight.T + bias, axis=-1); weight: [V, D], bias: [V]."""
    cfg = _tpu_defaults()
    tm = cfg["tm"] if tm is None else tm
    tv = cfg["tv"] if tv is None else tv
    params = prepare_generator_params(weight, bias, tv=tv,
                                      use_bf16_matmul=use_bf16_matmul)
    return generator_apply(x, params["w_t"], params["b_p"],
                           V=params["V"], tm=tm, tv=params["tv"],
                           weight_buffers=cfg["weight_buffers"],
                           vmem_cap=cfg["vmem_cap"], out_dtype=out_dtype)


if __name__ == "__main__":
    def reference(x, weight, bias, use_bf16):
        if use_bf16:
            xr = x.astype(jnp.bfloat16).astype(jnp.float32)
            wr = weight.astype(jnp.bfloat16).astype(jnp.float32)
        else:
            xr, wr = x, weight
        logits = jnp.einsum("...d,vd->...v", xr, wr,
                            precision=jax.lax.Precision.HIGHEST) + bias
        return jax.nn.log_softmax(logits, axis=-1)

    key = jax.random.PRNGKey(0)

    # Case 1: shapes implied by the module (d_model=32, vocab=128).
    B, S, D, V = 2, 8, 32, 128
    k1, k2, k3, key = jax.random.split(key, 4)
    x = jax.random.normal(k1, (B, S, D), dtype=jnp.float32)
    weight = jax.random.uniform(k2, (V, D), jnp.float32, -1.0, 1.0) / jnp.sqrt(D)
    bias = jax.random.uniform(k3, (V,), jnp.float32, -1.0, 1.0) / jnp.sqrt(D)

    out = jax.block_until_ready(generator_forward(x, weight, bias))
    assert out.shape == (B, S, V)
    ref_bf16 = reference(x, weight, bias, use_bf16=True)
    assert jnp.allclose(out, ref_bf16, atol=1e-4, rtol=1e-4), \
        float(jnp.max(jnp.abs(out - ref_bf16)))
    ref_f32 = reference(x, weight, bias, use_bf16=False)
    assert jnp.allclose(out, ref_f32, atol=5e-2, rtol=5e-2)

    # Case 2: hot-path usage — weight prepared once (pad + bf16 + transpose),
    # ragged row count, multiple vocab tiles, vocab padding.
    B2, S2, D2, V2 = 3, 7, 64, 384
    k1, k2, k3, key = jax.random.split(key, 4)
    x2 = jax.random.normal(k1, (B2, S2, D2), dtype=jnp.float32)
    w2 = jax.random.uniform(k2, (V2, D2), jnp.float32, -1.0, 1.0) / jnp.sqrt(D2)
    b2 = jax.random.uniform(k3, (V2,), jnp.float32, -1.0, 1.0) / jnp.sqrt(D2)

    cfg = _tpu_defaults()
    params = prepare_generator_params(w2, b2, tv=256)
    out2 = jax.block_until_ready(
        generator_apply(x2, params["w_t"], params["b_p"],
                        V=params["V"], tm=16, tv=params["tv"],
                        weight_buffers=cfg["weight_buffers"],
                        vmem_cap=cfg["vmem_cap"]))
    assert out2.shape == (B2, S2, V2)
    ref2 = reference(x2, w2, b2, use_bf16=True)
    assert jnp.allclose(out2, ref2, atol=1e-4, rtol=1e-4), \
        float(jnp.max(jnp.abs(out2 - ref2)))

    # Repeat call: the hot path reuses the already padded/cast/transposed weight.
    out2b = jax.block_until_ready(
        generator_apply(x2, params["w_t"], params["b_p"],
                        V=params["V"], tm=16, tv=params["tv"],
                        weight_buffers=cfg["weight_buffers"],
                        vmem_cap=cfg["vmem_cap"]))
    assert jnp.allclose(out2b, out2)

    print("KERNEL_OK")
</pallas_src>

<mosaic_0001>
module attributes {stable_mosaic.version = 11 : i64} {
  func.func @_normalize_kernel(%arg0: i32, %arg1: i32, %arg2: memref<16x128xf32, #tpu.memory_space<vmem>>, %arg3: memref<16x1xf32, #tpu.memory_space<vmem>>, %arg4: memref<16x128xf32, #tpu.memory_space<vmem>>) attributes {dimension_semantics = [#tpu.dimension_semantics<parallel>, #tpu.dimension_semantics<parallel>], iteration_bounds = array<i64: 1, 1>, scalar_prefetch = 0 : i64, scratch_operands = 0 : i64, tpu.core_type = #tpu.core_type<tc>, window_params = [{transform_indices = @transform_0, window_bounds = array<i64: 16, 128>}, {transform_indices = @transform_1, window_bounds = array<i64: 16, 1>}, {transform_indices = @transform_2, window_bounds = array<i64: 16, 128>}]} {
    %c0 = arith.constant 0 : index
    %c0_0 = arith.constant 0 : index
    %0 = vector.load %arg2[%c0, %c0_0] : memref<16x128xf32, #tpu.memory_space<vmem>>, vector<16x128xf32>
    %c0_1 = arith.constant 0 : index
    %c0_2 = arith.constant 0 : index
    %1 = vector.load %arg3[%c0_1, %c0_2] : memref<16x1xf32, #tpu.memory_space<vmem>>, vector<16x1xf32>
    %2 = vector.broadcast %1 : vector<16x1xf32> to vector<16x128xf32>
    %3 = arith.subf %0, %2 : vector<16x128xf32>
    %c0_3 = arith.constant 0 : index
    %c0_4 = arith.constant 0 : index
    %4 = vector.load %arg4[%c0_3, %c0_4] : memref<16x128xf32, #tpu.memory_space<vmem>>, vector<16x128xf32>
    tpu.vector_store %arg4[%c0_3, %c0_4], %3 {strides = array<i32>} : memref<16x128xf32, #tpu.memory_space<vmem>>, vector<16x128xf32>,
    return
  }
  func.func @transform_0(%arg0: i32, %arg1: i32) -> (i32, i32) {
    %c0_i32 = arith.constant 0 : i32
    return %arg0, %arg1 : i32, i32
  }
  func.func @transform_1(%arg0: i32, %arg1: i32) -> (i32, i32) {
    %c0_i32 = arith.constant 0 : i32
    %c0_i32_0 = arith.constant 0 : i32
    return %arg0, %c0_i32 : i32, i32
  }
  func.func @transform_2(%arg0: i32, %arg1: i32) -> (i32, i32) {
    %c0_i32 = arith.constant 0 : i32
    return %arg0, %arg1 : i32, i32
  }
}

module attributes {stable_mosaic.version = 11 : i64} {
  func.func @_logits_lse_kernel(%arg0: i32, %arg1: i32, %arg2: memref<16x32xbf16, #tpu.memory_space<vmem>>, %arg3: memref<32x128xbf16, #tpu.memory_space<vmem>>, %arg4: memref<1x128xf32, #tpu.memory_space<vmem>>, %arg5: memref<16x128xf32, #tpu.memory_space<vmem>>, %arg6: memref<16x1xf32, #tpu.memory_space<vmem>>, %arg7: memref<16x1xf32, #tpu.memory_space<vmem>>, %arg8: memref<16x1xf32, #tpu.memory_space<vmem>>) attributes {dimension_semantics = [#tpu.dimension_semantics<parallel>, #tpu.dimension_semantics<arbitrary>], iteration_bounds = array<i64: 1, 1>, scalar_prefetch = 0 : i64, scratch_operands = 2 : i64, tpu.core_type = #tpu.core_type<tc>, window_params = [{transform_indices = @transform_0, window_bounds = array<i64: 16, 32>}, {transform_indices = @transform_1, window_bounds = array<i64: 32, 128>}, {pipeline_mode = #tpu.pipeline_mode<synchronous>, transform_indices = @transform_2, window_bounds = array<i64: 1, 128>}, {transform_indices = @transform_3, window_bounds = array<i64: 16, 128>}, {transform_indices = @transform_4, window_bounds = array<i64: 16, 1>}]} {
    %c0_i32 = arith.constant 0 : i32
    %0 = arith.cmpi eq, %arg1, %c0_i32 : i32
    %1 = arith.extui %0 : i1 to i32
    %c0_i32_0 = arith.constant 0 : i32
    %2 = arith.cmpi ne, %1, %c0_i32_0 : i32
    scf.if %2 {
      %cst_19 = arith.constant -1.000000e+30 : f32
      %32 = vector.broadcast %cst_19 : f32 to vector<16x1xf32>
      %c0_20 = arith.constant 0 : index
      %c0_21 = arith.constant 0 : index
      %33 = vector.load %arg7[%c0_20, %c0_21] : memref<16x1xf32, #tpu.memory_space<vmem>>, vector<16x1xf32>
      tpu.vector_store %arg7[%c0_20, %c0_21], %32 {strides = array<i32>} : memref<16x1xf32, #tpu.memory_space<vmem>>, vector<16x1xf32>,
      %cst_22 = arith.constant 0.000000e+00 : f32
      %34 = vector.broadcast %cst_22 : f32 to vector<16x1xf32>
      %c0_23 = arith.constant 0 : index
      %c0_24 = arith.constant 0 : index
      %35 = vector.load %arg8[%c0_23, %c0_24] : memref<16x1xf32, #tpu.memory_space<vmem>>, vector<16x1xf32>
      tpu.vector_store %arg8[%c0_23, %c0_24], %34 {strides = array<i32>} : memref<16x1xf32, #tpu.memory_space<vmem>>, vector<16x1xf32>,
    } else {
    }
    %c0 = arith.constant 0 : index
    %c0_1 = arith.constant 0 : index
    %3 = vector.load %arg2[%c0, %c0_1] : memref<16x32xbf16, #tpu.memory_space<vmem>>, vector<16x32xbf16>
    %c0_2 = arith.constant 0 : index
    %c0_3 = arith.constant 0 : index
    %4 = vector.load %arg3[%c0_2, %c0_3] : memref<32x128xbf16, #tpu.memory_space<vmem>>, vector<32x128xbf16>
    %cst = arith.constant dense<0.000000e+00> : vector<16x128xf32>
    %5 = tpu.matmul %3, %4, %cst {dimension_numbers = #tpu.dot_dimension_numbers<[1], [0], [0], [1], [0, 0, 1, 1], [], []>} : vector<16x32xbf16>, vector<32x128xbf16>, vector<16x128xf32> -> vector<16x128xf32>
    %c128_i32 = arith.constant 128 : i32
    %6 = arith.muli %arg1, %c128_i32 : i32
    %7 = tpu.assume_multiple %6, 128 : i32
    %c0_4 = arith.constant 0 : index
    %8 = arith.index_cast %7 : i32 to index
    %9 = vector.load %arg4[%c0_4, %8] : memref<1x128xf32, #tpu.memory_space<vmem>>, vector<1x128xf32>
    %10 = vector.broadcast %9 : vector<1x128xf32> to vector<16x128xf32>
    %11 = arith.addf %5, %10 : vector<16x128xf32>
    %c0_5 = arith.constant 0 : index
    %c0_6 = arith.constant 0 : index
    %12 = vector.load %arg5[%c0_5, %c0_6] : memref<16x128xf32, #tpu.memory_space<vmem>>, vector<16x128xf32>
    tpu.vector_store %arg5[%c0_5, %c0_6], %11 {strides = array<i32>} : memref<16x128xf32, #tpu.memory_space<vmem>>, vector<16x128xf32>,
    %c0_7 = arith.constant 0 : index
    %c0_8 = arith.constant 0 : index
    %13 = vector.load %arg7[%c0_7, %c0_8] : memref<16x1xf32, #tpu.memory_space<vmem>>, vector<16x1xf32>
    %cst_9 = arith.constant dense<0xFF800000> : vector<16xf32>
    %14 = vector.multi_reduction <maximumf>, %11, %cst_9 [1] : vector<16x128xf32> to vector<16xf32>
    %15 = vector.shape_cast %14 : vector<16xf32> to vector<16x1xf32>
    %16 = arith.maximumf %13, %15 : vector<16x1xf32>
    %c0_10 = arith.constant 0 : index
    %c0_11 = arith.constant 0 : index
    %17 = vector.load %arg8[%c0_10, %c0_11] : memref<16x1xf32, #tpu.memory_space<vmem>>, vector<16x1xf32>
    %18 = arith.subf %13, %16 : vector<16x1xf32>
    %19 = math.exp %18 : vector<16x1xf32>
    %20 = arith.mulf %17, %19 : vector<16x1xf32>
    %21 = vector.broadcast %16 : vector<16x1xf32> to vector<16x128xf32>
    %22 = arith.subf %11, %21 : vector<16x128xf32>
    %23 = math.exp %22 : vector<16x128xf32>
    %cst_12 = arith.constant dense<0.000000e+00> : vector<16xf32>
    %24 = vector.multi_reduction <add>, %23, %cst_12 [1] : vector<16x128xf32> to vector<16xf32>
    %25 = vector.shape_cast %24 : vector<16xf32> to vector<16x1xf32>
    %26 = arith.addf %20, %25 : vector<16x1xf32>
    %c0_13 = arith.constant 0 : index
    %c0_14 = arith.constant 0 : index
    %27 = vector.load %arg8[%c0_13, %c0_14] : memref<16x1xf32, #tpu.memory_space<vmem>>, vector<16x1xf32>
    tpu.vector_store %arg8[%c0_13, %c0_14], %26 {strides = array<i32>} : memref<16x1xf32, #tpu.memory_space<vmem>>, vector<16x1xf32>,
    %c0_15 = arith.constant 0 : index
    %c0_16 = arith.constant 0 : index
    %28 = vector.load %arg7[%c0_15, %c0_16] : memref<16x1xf32, #tpu.memory_space<vmem>>, vector<16x1xf32>
    tpu.vector_store %arg7[%c0_15, %c0_16], %16 {strides = array<i32>} : memref<16x1xf32, #tpu.memory_space<vmem>>, vector<16x1xf32>,
    %c0_i32_17 = arith.constant 0 : i32
    %29 = arith.cmpi eq, %arg1, %c0_i32_17 : i32
    %30 = arith.extui %29 : i1 to i32
    %c0_i32_18 = arith.constant 0 : i32
    %31 = arith.cmpi ne, %30, %c0_i32_18 : i32
    scf.if %31 {
      %c0_19 = arith.constant 0 : index
      %c0_20 = arith.constant 0 : index
      %32 = vector.load %arg7[%c0_19, %c0_20] : memref<16x1xf32, #tpu.memory_space<vmem>>, vector<16x1xf32>
      %c0_21 = arith.constant 0 : index
      %c0_22 = arith.constant 0 : index
      %33 = vector.load %arg8[%c0_21, %c0_22] : memref<16x1xf32, #tpu.memory_space<vmem>>, vector<16x1xf32>
      %34 = math.log %33 : vector<16x1xf32>
      %35 = arith.addf %32, %34 : vector<16x1xf32>
      %c0_23 = arith.constant 0 : index
      %c0_24 = arith.constant 0 : index
      %36 = vector.load %arg6[%c0_23, %c0_24] : memref<16x1xf32, #tpu.memory_space<vmem>>, vector<16x1xf32>
      tpu.vector_store %arg6[%c0_23, %c0_24], %35 {strides = array<i32>} : memref<16x1xf32, #tpu.memory_space<vmem>>, vector<16x1xf32>,
    } else {
    }
    return
  }
  func.func @transform_0(%arg0: i32, %arg1: i32) -> (i32, i32) {
    %c0_i32 = arith.constant 0 : i32
    %c0_i32_0 = arith.constant 0 : i32
    return %arg0, %c0_i32 : i32, i32
  }
  func.func @transform_1(%arg0: i32, %arg1: i32) -> (i32, i32) {
    %c0_i32 = arith.constant 0 : i32
    %c0_i32_0 = arith.constant 0 : i32
    return %c0_i32, %arg1 : i32, i32
  }
  func.func @transform_2(%arg0: i32, %arg1: i32) -> (i32, i32) {
    %c0_i32 = arith.constant 0 : i32
    %c0_i32_0 = arith.constant 0 : i32
    %c0_i32_1 = arith.constant 0 : i32
    return %c0_i32, %c0_i32_0 : i32, i32
  }
  func.func @transform_3(%arg0: i32, %arg1: i32) -> (i32, i32) {
    %c0_i32 = arith.constant 0 : i32
    return %arg0, %arg1 : i32, i32
  }
  func.func @transform_4(%arg0: i32, %arg1: i32) -> (i32, i32) {
    %c0_i32 = arith.constant 0 : i32
    %c0_i32_0 = arith.constant 0 : i32
    return %arg0, %c0_i32 : i32, i32
  }
}

</mosaic_0001>

<bundles_post_ra>
// kernel: generator_apply.3
= control target key start
LH: loop header
LB: loop body
LE: loop exit
PB: predicated region body
PF: predicated region fallthrough
CT: control target
= control target key end

     0   :  { %s113_s0 = inlined_call_operand.vmem [shape: f32[16,128], index: 0, kind: input, shape index: {}]   ;;  %s114_s1 = inlined_call_operand.vmem [shape: f32[16,1], index: 1, kind: input, shape index: {}]   ;;  %s115_s2 = inlined_call_operand.hbm [shape: f32[16,128], index: 2, kind: output, shape index: {}]  }
   0x1   :  { %v14_v0 = vld [vmem:[%s114_s1] sm:$0xff] }
   0x2   :  { %7 = vsyncpa [#allocation3], 0  ;;  %v79_v1 = vmov 0   ;;  %v15_v2 = vld [vmem:[%s114_s1 + $0x8] sm:$0xff]  ;;  %v12_v3 = vld [vmem:[%s113_s0] sm:$0xff]  ;;  %s80_s15 = smov [#allocation2]  }
   0x3   :  { %52 = vset.pattern.permute.xlu0 %v79_v1  ;;  %s34_s16 = sshll.u32 %s80_s15, 4  ;;  %s36_s19 = sshll.u32 %s115_s2, 4  ;;  %v13_v6 = vld [vmem:[%s113_s0 + $0x8] sm:$0xff]  ;;  %s35_s16 = int_to_ptr.vmem [resolvable:$true] %s34_s16  ;;  %s37_s19 = int_to_ptr.hbm [resolvable:$true] %s36_s19 }
   0x4   :  { %18 = vperm.xlu0 %52, %v14_v0   ;;  %s81_s1 = smov 128   ;;  %s82_s22 = smov 8  }
   0xc   :  { %23 = vperm.xlu0 %52, %v15_v2  }
  0x76   :  { %v19_v4 = vpop.permute.xlu0 %18 }
  0x77   :  { %v26_v5 = vsub.f32 %v12_v3, %v19_v4 }
  0x79   :  { %28 = vst [vmem:[#allocation2] sm:$0xff] %v26_v5 }
  0x7e   :  { %v24_v7 = vpop.permute.xlu0 %23 }
  0x7f   :  { %v27_v8 = vsub.f32 %v13_v6, %v24_v7 }
  0x81   :  { %29 = vst [vmem:[#allocation2 + $0x8] sm:$0xff] %v27_v8 }
  0x82   :  { %42 = dma.vmem_to_hbm [thread:$0]  %s35_s16, 256, %s37_s19, [#allocation3], %s81_s1, %s81_s1, %s82_s22  }
  0x83   :  { %77 = dma.done.wait [#allocation3], 256  }
  0x84   :  { %78 = vsyncadd [#allocation3], 4294967040 }
  0x85   :  { %47 = vsyncpa [#allocation3], 1 }

// kernel: generator_apply.2
= control target key start
LH: loop header
LB: loop body
LE: loop exit
PB: predicated region body
PF: predicated region fallthrough
CT: control target
= control target key end

     0   :  { %vm57_vm0 = vcmask 261120   ;;  %vm21_vm1 = vcmask 7168   ;;  %v180_v3 = vmov -1e+30   ;;  %v181_v9 = vmov 0   ;;  %s242_s1 = inlined_call_operand.vmem [shape: bf16[32,128], index: 1, kind: input, shape index: {}]   ;;  %s243_s2 = inlined_call_operand.vmem [shape: f32[1,128], index: 2, kind: input, shape index: {}]   ;;  %s244_s0 = inlined_call_operand.vmem [shape: bf16[16,32], index: 0, kind: input, shape index: {}]   ;;  %s245_s3 = inlined_call_operand.vmem [shape: f32[16,128], index: 3, kind: output, shape index: {0}]   ;;  %s246_s4 = inlined_call_operand.vmem [shape: f32[16,1], index: 4, kind: output, shape index: {1}]  }
   0x1   :  { %v161_v0 = vld [vmem:[%s242_s1 + $0x8] sm:$0xff]  ;;  %v160_v1 = vld [vmem:[%s242_s1] sm:$0xff]  ;;  %22 = vst.msk [vmem:[#allocation2] sm:$0xff] %vm21_vm1, %v180_v3  ;;  %165 = vset.pattern.permute.xlu1 %v181_v9  ;;  %166 = vset.pattern.permute.xlu0 %v181_v9  ;;  %v182_v10 = vmov 0.0  }
   0x2   :  { %67 = vmatpush.bf16.msra.mxu0 %v161_v0  ;;  %v159_v2 = vld [vmem:[%s244_s0] sm:$0xff]  ;;  %23 = vst.msk [vmem:[#allocation2 + $0x8] sm:$0xff] %vm21_vm1, %v180_v3 }
   0x3   :  { %v167_v4 = vld [vmem:[%s243_s2] ss:$0 sm:$0xff]  ;;  %24 = vst.msk [vmem:[#allocation3] sm:$0xff] %vm21_vm1, %v182_v10 }
   0x4   :  { %25 = vst.msk [vmem:[#allocation3 + $0x8] sm:$0xff] %vm21_vm1, %v182_v10 }
   0x6   :  { %68 = vmatpush.bf16.msra.mxu0 %v160_v1 }
   0x8   :  { %v77_v11 = vld [vmem:[#allocation2] sm:$0xff] }
   0x9   :  { %158 = vmatmul.msk.bf16.vlgmr.msra.gmra.mxu0 %vm57_vm0, %v159_v2  ;;  %v78_v15 = vld [vmem:[#allocation2 + $0x8] sm:$0xff] }
   0xa   :  { %v85_v30 = vld [vmem:[#allocation3] sm:$0xff] }
   0xb   :  { %v86_v35 = vld [vmem:[#allocation3 + $0x8] sm:$0xff] }
  0x86   :  { %v70_v5 = vpop.f32.mrf.mxu0 }
  0x87   :  { %v71_v6 = vadd.f32 %v167_v4, %v70_v5 }
  0x89   :  { %75 = vst [vmem:[%s245_s3] sm:$0xff] %v71_v6  ;;  %79 = vmax.xlane.f32.xlu0 %v71_v6 }
  0x8e   :  { %v72_v7 = vpop.f32.mrf.mxu0 }
  0x8f   :  { %v73_v8 = vadd.f32 %v167_v4, %v72_v7 }
  0x91   :  { %76 = vst [vmem:[%s245_s3 + $0x8] sm:$0xff] %v73_v8  ;;  %81 = vmax.xlane.f32.xlu0 %v73_v8 }
  0xfc   :  { %v80_v12 = vpop.xlane.xlu0 %79 }
  0xfd   :  { %v83_v13 = vmax.f32 %v77_v11, %v80_v12 }
  0xff   :  { %v87_v14 = vsub.f32 %v77_v11, %v83_v13  ;;  %120 = vst.msk [vmem:[#allocation2] sm:$0xff] %vm21_vm1, %v83_v13  ;;  %97 = vperm.xlu1 %165, %v83_v13  }
 0x101   :  { %v89_v27 = vmul.f32 1.442695, %v87_v14 }
 0x104   :  { %v82_v16 = vpop.xlane.xlu0 %81 }
 0x105   :  { %v84_v17 = vmax.f32 %v78_v15, %v82_v16 }
 0x106   :  { %v125_v43 = vld [vmem:[#allocation2] sm:$0xff] }
 0x107   :  { %v88_v18 = vsub.f32 %v78_v15, %v84_v17  ;;  %121 = vst.msk [vmem:[#allocation2 + $0x8] sm:$0xff] %vm21_vm1, %v84_v17  ;;  %102 = vperm.xlu1 %165, %v84_v17  }
 0x109   :  { %v91_v28 = vmul.f32 1.442695, %v88_v18 }
 0x10e   :  { %v126_v47 = vld [vmem:[#allocation2 + $0x8] sm:$0xff] }
 0x171   :  { %v98_v19 = vpop.permute.xlu1 %97 }
 0x172   :  { %v105_v20 = vsub.f32 %v71_v6, %v98_v19 }
 0x174   :  { %v107_v21 = vmul.f32 1.442695, %v105_v20 }
 0x176   :  { %168 = vpow2.f32 %v107_v21 }
 0x179   :  { %v103_v22 = vpop.permute.xlu1 %102 }
 0x17a   :  { %v106_v23 = vsub.f32 %v73_v8, %v103_v22 }
 0x17c   :  { %v169_v24 = vpop.eup %168  ;;  %v109_v25 = vmul.f32 1.442695, %v106_v23 }
 0x17d   :  { %111 = vadd.xlane.f32.xlu2 %v169_v24 }
 0x17e   :  { %170 = vpow2.f32 %v109_v25 }
 0x17f   :  { %172 = vpow2.f32 %v89_v27 }
 0x180   :  { %174 = vpow2.f32 %v91_v28 }
 0x184   :  { %v171_v26 = vpop.eup %170 }
 0x185   :  { %113 = vadd.xlane.f32.xlu2 %v171_v26  ;;  %v173_v29 = vpop.eup %172 }
 0x186   :  { %v93_v31 = vmul.f32 %v173_v29, %v85_v30  ;;  %v175_v34 = vpop.eup %174 }
 0x187   :  { %v94_v36 = vmul.f32 %v175_v34, %v86_v35 }
 0x1f0   :  { %v112_v32 = vpop.xlane.xlu2 %111 }
 0x1f1   :  { %v115_v33 = vadd.f32 %v112_v32, %v93_v31 }
 0x1f3   :  { %118 = vst.msk [vmem:[#allocation3] sm:$0xff] %vm21_vm1, %v115_v33 }
 0x1f8   :  { %v114_v37 = vpop.xlane.xlu2 %113 }
 0x1f9   :  { %v116_v38 = vadd.f32 %v114_v37, %v94_v36 }
 0x1fa   :  { %v127_v39 = vld [vmem:[#allocation3] sm:$0xff] }
 0x1fb   :  { %176 = vlog2.f32 %v127_v39  ;;  %119 = vst.msk [vmem:[#allocation3 + $0x8] sm:$0xff] %vm21_vm1, %v116_v38 }
 0x201   :  { %v177_v40 = vpop.eup %176 }
 0x202   :  { %v130_v41 = vmul.f32 0.6931472, %v177_v40  ;;  %v128_v42 = vld [vmem:[#allocation3 + $0x8] sm:$0xff] }
 0x203   :  { %178 = vlog2.f32 %v128_v42 }
 0x204   :  { %v133_v44 = vadd.f32 %v130_v41, %v125_v43 }
 0x206   :  { %135 = vst.msk [vmem:[%s246_s4] sm:$0xff] %vm21_vm1, %v133_v44 }
 0x209   :  { %v179_v45 = vpop.eup %178 }
 0x20a   :  { %v132_v46 = vmul.f32 0.6931472, %v179_v45 }
 0x20c   :  { %v134_v48 = vadd.f32 %v132_v46, %v126_v47 }
 0x20e   :  { %136 = vst.msk [vmem:[%s246_s4 + $0x8] sm:$0xff] %vm21_vm1, %v134_v48 }

</bundles_post_ra>
